<compile_context>
chip_gen: v5e
topology: v5e:2x2
jax: 0.10.0
libtpu: 0.0.40
codegen_flags: <defaults>
</compile_context>

<pallas_src>
import jax
import jax.numpy as jnp
from jax.experimental import pallas as pl
from jax.experimental.pallas import tpu as pltpu

# --- model sizes (small, deterministic) ---
N = 16            # memory rows
M = 8             # memory width
HEADS = 2         # head_num
CTRL = 32         # controller_size
B = 2             # batch
HB = B * HEADS    # folded rows, batch-major: r = b * HEADS + h
L = 3 * M + 6     # original per-head split: M + 1 + 1 + 3 + 1 + M + M = 30
OUT = HEADS * L   # original fc_write width = 60

# lane-aligned packed layout (per head): every field starts at a multiple of 8
LP = 64
FIELD_SRC = [0, M, M + 1, M + 2, M + 5, M + 6, 2 * M + 6]   # offsets within L
FIELD_WID = [M, 1, 1, 3, 1, M, M]
FIELD_DST = [0, 8, 16, 24, 32, 40, 48]                      # offsets within LP


def _softplus(x):
    # stable softplus
    return jnp.maximum(x, 0.0) + jnp.log(1.0 + jnp.exp(-jnp.abs(x)))


def _sigmoid(x):
    # overflow-free sigmoid: exp of a non-positive argument only
    z = jnp.exp(-jnp.abs(x))
    return jnp.where(x >= 0.0, 1.0, z) / (1.0 + z)


def pack_fc_write(w_fc, b_fc):
    """One-time host-side layout change for the fc_write parameters.

    Maps the (CTRL, HEADS*L) weight / (HEADS*L,) bias to a lane-aligned
    (CTRL, HEADS*LP) / (1, HEADS*LP) layout: head h occupies lanes
    [h*LP, (h+1)*LP) and each field starts at a multiple of 8 (zero padding
    in between), so all in-kernel slices are aligned and the matmul output
    is a lane-dense (B, 128) slab.
    """
    w_p = jnp.zeros((CTRL, HEADS * LP), jnp.float32)
    b_p = jnp.zeros((HEADS * LP,), jnp.float32)
    for h in range(HEADS):
        for so, fw, do in zip(FIELD_SRC, FIELD_WID, FIELD_DST):
            w_p = w_p.at[:, h * LP + do:h * LP + do + fw].set(
                w_fc[:, h * L + so:h * L + so + fw])
            b_p = b_p.at[h * LP + do:h * LP + do + fw].set(
                b_fc[h * L + so:h * L + so + fw])
    return w_p, b_p.reshape(1, HEADS * LP)


def ntm_write_head_kernel(x_ref, w_fc_ref, b_fc_ref, wprev_ref, mem_ref,
                          w_ref, e_ref, a_ref, o2_ref):
    # fc_write on the MXU: (B, C) @ (C, HEADS*LP) + bias -> lane-dense (B, 128)
    o = jnp.dot(x_ref[...], w_fc_ref[...],
                preferred_element_type=jnp.float32) + b_fc_ref[...]

    # Fold the per-head 64-lane blocks onto sublanes, batch-major row order
    # r = b*HEADS + h (this order is what makes the w_prev input and the three
    # outputs free contiguous reshapes on the wrapper side).  Staged through a
    # tiny VMEM scratch: 4 single-row stores + 1 load.
    for b in range(B):
        for h in range(HEADS):
            r = b * HEADS + h
            o2_ref[r:r + 1, :] = o[b:b + 1, h * LP:(h + 1) * LP]
    o2 = o2_ref[...]                                     # (HB, LP)

    # Aligned field slices (offsets are multiples of 8 by construction).
    k     = o2[:, 0:M]                                   # (HB, M)
    beta  = o2[:, 8:9]                                   # (HB, 1)
    g     = o2[:, 16:17]                                 # (HB, 1)
    s     = o2[:, 24:27]                                 # (HB, 3)
    gamma = o2[:, 32:33]                                 # (HB, 1)
    e_raw = o2[:, 40:40 + M]                             # (HB, M)
    a_out = o2[:, 48:48 + M]                             # (HB, M)

    # e / a are independent of the addressing pipeline -- emit them up front
    # with full, unstrided stores.
    e_ref[...] = _sigmoid(e_raw)
    a_ref[...] = a_out

    beta  = _softplus(beta)
    g     = _sigmoid(g)
    gamma = 1.0 + _softplus(gamma)

    # softmax over the 3 shift weights (exact divides kept for tight parity).
    s = jnp.exp(s - jnp.max(s, axis=-1, keepdims=True))
    s = s / jnp.sum(s, axis=-1, keepdims=True)

    # --- content addressing: softmax(beta * cosine(k, memory rows)) ---
    # memory arrives un-replicated (B, N, M); per-head replication is two
    # leading-dim tile copies in-register (rows r use memory[r // HEADS]).
    memv = mem_ref[...]                                  # (B, N, M)
    mem = jnp.concatenate(
        [memv[b:b + 1] for b in range(B) for _ in range(HEADS)],
        axis=0) + 1e-16                                  # (HB, N, M)
    mem_norm = jnp.sqrt(jnp.sum(mem * mem, axis=-1))     # (HB, N)
    kk = k + 1e-16
    k_norm = jnp.sqrt(jnp.sum(kk * kk, axis=-1, keepdims=True))   # (HB, 1)
    # one folded multiply-reduce pass for both heads (VPU+XLU; MXU path only
    # worth it if profiling shows this chain on the critical path)
    dot = jnp.sum(kk[:, None, :] * mem, axis=-1)         # (HB, N)
    cos = dot / jnp.maximum(k_norm * mem_norm, 1e-8)
    z = beta * cos
    ez = jnp.exp(z - jnp.max(z, axis=-1, keepdims=True))
    wc = ez / jnp.sum(ez, axis=-1, keepdims=True)        # (HB, N)

    # --- interpolation with previous weights (already (HB, N), batch-major) ---
    wg = g * wc + (1.0 - g) * wprev_ref[...]

    # --- circular 3-tap shift ---
    w_hat = (jnp.roll(wg, 1, axis=-1) * s[:, 0:1]
             + wg * s[:, 1:2]
             + jnp.roll(wg, -1, axis=-1) * s[:, 2:3])

    # --- sharpening (clamp before log: w_hat can underflow to exactly 0) ---
    w_pow = jnp.exp(gamma * jnp.log(jnp.maximum(w_hat, 1e-30)))
    w_ref[...] = w_pow / (jnp.sum(w_pow, axis=-1, keepdims=True) + 1e-16)


@jax.jit
def ntm_write_head(x, w_fc_packed, b_fc_packed, w_prev, memory):
    """NTMWriteHead.forward: returns ((w, e, a), w).

    x: (B, CTRL); w_prev: (B, HEADS, N); memory: (B, N, M).
    w_fc_packed / b_fc_packed come from pack_fc_write() (one-time layout change).
    """
    # Contiguous (b, h)-major reshape: a free bitcast under XLA (no transpose,
    # no broadcast, no extra fusion kernels around the pallas_call).
    w_prev_f = w_prev.reshape(HB, N)

    vmem = pl.BlockSpec(memory_space=pltpu.MemorySpace.VMEM)
    w_f, e_f, a_f = pl.pallas_call(
        ntm_write_head_kernel,
        out_shape=(jax.ShapeDtypeStruct((HB, N), jnp.float32),
                   jax.ShapeDtypeStruct((HB, M), jnp.float32),
                   jax.ShapeDtypeStruct((HB, M), jnp.float32)),
        in_specs=[vmem] * 5,
        out_specs=(vmem, vmem, vmem),
        scratch_shapes=[pltpu.VMEM((HB, LP), jnp.float32)],
    )(x, w_fc_packed, b_fc_packed, w_prev_f, memory)

    # Free contiguous reshapes (bitcasts) back to the module's output shapes.
    w = w_f.reshape(B, HEADS, N)
    e = e_f.reshape(B, HEADS, M)
    a = a_f.reshape(B, HEADS, M)
    return (w, e, a), w


def reference(x, w_fc, b_fc, w_prev, memory):
    """Pure-JAX reference mirroring the PyTorch semantics (original params)."""
    o = (x @ w_fc + b_fc).reshape(B, HEADS, L)
    k, beta, g, s, gamma, e, a = jnp.split(
        o, [M, M + 1, M + 2, M + 5, M + 6, 2 * M + 6], axis=-1)
    beta = jax.nn.softplus(beta)
    g = jax.nn.sigmoid(g)
    s = jax.nn.softmax(s, axis=-1)
    gamma = 1.0 + jax.nn.softplus(gamma)
    e = jax.nn.sigmoid(e)

    mem = memory + 1e-16
    kk = k + 1e-16
    dot = jnp.einsum('bhm,bnm->bhn', kk, mem)
    kn = jnp.sqrt(jnp.sum(kk * kk, axis=-1, keepdims=True))
    mn = jnp.sqrt(jnp.sum(mem * mem, axis=-1))
    cos = dot / jnp.maximum(kn * mn[:, None, :], 1e-8)
    wc = jax.nn.softmax(beta * cos, axis=-1)
    wg = g * wc + (1.0 - g) * w_prev
    w_m1 = jnp.roll(wg, 1, axis=-1)
    w_p1 = jnp.roll(wg, -1, axis=-1)
    w_hat = w_m1 * s[..., 0:1] + wg * s[..., 1:2] + w_p1 * s[..., 2:3]
    w_pow = w_hat ** gamma
    w = w_pow / (jnp.sum(w_pow, axis=-1, keepdims=True) + 1e-16)
    return w, e, a


if __name__ == "__main__":
    key = jax.random.PRNGKey(0)
    k1, k2, k3, k4, k5 = jax.random.split(key, 5)

    # deterministic param init (PyTorch Linear-style uniform), stored transposed
    bound = 1.0 / jnp.sqrt(jnp.float32(CTRL))
    w_fc = jax.random.uniform(k1, (CTRL, OUT), jnp.float32, -bound, bound)
    b_fc = jax.random.uniform(k2, (OUT,), jnp.float32, -bound, bound)

    # inputs
    x = jax.random.normal(k3, (B, CTRL), jnp.float32)
    w_prev = jax.nn.softmax(jax.random.normal(k4, (B, HEADS, N), jnp.float32),
                            axis=-1)
    memory = jax.random.normal(k5, (B, N, M), jnp.float32) * 0.1

    # one-time lane-aligned re-packing of the fc_write parameters
    w_fc_p, b_fc_p = pack_fc_write(w_fc, b_fc)

    (w, e, a), w2 = ntm_write_head(x, w_fc_p, b_fc_p, w_prev, memory)
    jax.block_until_ready((w, e, a, w2))

    w_ref, e_ref, a_ref = reference(x, w_fc, b_fc, w_prev, memory)
    assert jnp.allclose(w, w_ref, atol=5e-5, rtol=5e-5), "w mismatch"
    assert jnp.allclose(e, e_ref, atol=5e-5, rtol=5e-5), "e mismatch"
    assert jnp.allclose(a, a_ref, atol=5e-5, rtol=5e-5), "a mismatch"
    assert jnp.allclose(w2, w_ref, atol=5e-5, rtol=5e-5), "w (second return) mismatch"

    print("KERNEL_OK")
</pallas_src>

<mosaic_0001>
module attributes {stable_mosaic.version = 11 : i64} {
  func.func @ntm_write_head_kernel(%arg0: memref<2x32xf32, #tpu.memory_space<vmem>>, %arg1: memref<32x128xf32, #tpu.memory_space<vmem>>, %arg2: memref<1x128xf32, #tpu.memory_space<vmem>>, %arg3: memref<4x16xf32, #tpu.memory_space<vmem>>, %arg4: memref<2x16x8xf32, #tpu.memory_space<vmem>>, %arg5: memref<4x16xf32, #tpu.memory_space<vmem>>, %arg6: memref<4x8xf32, #tpu.memory_space<vmem>>, %arg7: memref<4x8xf32, #tpu.memory_space<vmem>>, %arg8: memref<4x64xf32, #tpu.memory_space<vmem>>) attributes {dimension_semantics = [], scalar_prefetch = 0 : i64, scratch_operands = 1 : i64, tpu.core_type = #tpu.core_type<tc>} {
    %c0 = arith.constant 0 : index
    %c0_0 = arith.constant 0 : index
    %0 = vector.load %arg0[%c0, %c0_0] : memref<2x32xf32, #tpu.memory_space<vmem>>, vector<2x32xf32>
    %c0_1 = arith.constant 0 : index
    %c0_2 = arith.constant 0 : index
    %1 = vector.load %arg1[%c0_1, %c0_2] : memref<32x128xf32, #tpu.memory_space<vmem>>, vector<32x128xf32>
    %cst = arith.constant dense<0.000000e+00> : vector<2x128xf32>
    %2 = tpu.matmul %0, %1, %cst {dimension_numbers = #tpu.dot_dimension_numbers<[1], [0], [0], [1], [0, 0, 1, 1], [], []>} : vector<2x32xf32>, vector<32x128xf32>, vector<2x128xf32> -> vector<2x128xf32>
    %c0_3 = arith.constant 0 : index
    %c0_4 = arith.constant 0 : index
    %3 = vector.load %arg2[%c0_3, %c0_4] : memref<1x128xf32, #tpu.memory_space<vmem>>, vector<1x128xf32>
    %4 = vector.broadcast %3 : vector<1x128xf32> to vector<2x128xf32>
    %5 = arith.addf %2, %4 : vector<2x128xf32>
    %6 = vector.extract_strided_slice %5 {offsets = [0, 0], sizes = [1, 64], strides = [1, 1]} : vector<2x128xf32> to vector<1x64xf32>
    %c0_5 = arith.constant 0 : index
    %c0_6 = arith.constant 0 : index
    %7 = vector.load %arg8[%c0_5, %c0_6] : memref<4x64xf32, #tpu.memory_space<vmem>>, vector<1x64xf32>
    tpu.vector_store %arg8[%c0_5, %c0_6], %6 {strides = array<i32>} : memref<4x64xf32, #tpu.memory_space<vmem>>, vector<1x64xf32>,
    %8 = vector.extract_strided_slice %5 {offsets = [0, 64], sizes = [1, 64], strides = [1, 1]} : vector<2x128xf32> to vector<1x64xf32>
    %c1 = arith.constant 1 : index
    %c0_7 = arith.constant 0 : index
    %9 = vector.load %arg8[%c1, %c0_7] : memref<4x64xf32, #tpu.memory_space<vmem>>, vector<1x64xf32>
    tpu.vector_store %arg8[%c1, %c0_7], %8 {strides = array<i32>} : memref<4x64xf32, #tpu.memory_space<vmem>>, vector<1x64xf32>,
    %10 = vector.extract_strided_slice %5 {offsets = [1, 0], sizes = [1, 64], strides = [1, 1]} : vector<2x128xf32> to vector<1x64xf32>
    %c2 = arith.constant 2 : index
    %c0_8 = arith.constant 0 : index
    %11 = vector.load %arg8[%c2, %c0_8] : memref<4x64xf32, #tpu.memory_space<vmem>>, vector<1x64xf32>
    tpu.vector_store %arg8[%c2, %c0_8], %10 {strides = array<i32>} : memref<4x64xf32, #tpu.memory_space<vmem>>, vector<1x64xf32>,
    %12 = vector.extract_strided_slice %5 {offsets = [1, 64], sizes = [1, 64], strides = [1, 1]} : vector<2x128xf32> to vector<1x64xf32>
    %c3 = arith.constant 3 : index
    %c0_9 = arith.constant 0 : index
    %13 = vector.load %arg8[%c3, %c0_9] : memref<4x64xf32, #tpu.memory_space<vmem>>, vector<1x64xf32>
    tpu.vector_store %arg8[%c3, %c0_9], %12 {strides = array<i32>} : memref<4x64xf32, #tpu.memory_space<vmem>>, vector<1x64xf32>,
    %c0_10 = arith.constant 0 : index
    %c0_11 = arith.constant 0 : index
    %14 = vector.load %arg8[%c0_10, %c0_11] : memref<4x64xf32, #tpu.memory_space<vmem>>, vector<4x64xf32>
    %15 = vector.extract_strided_slice %14 {offsets = [0, 0], sizes = [4, 8], strides = [1, 1]} : vector<4x64xf32> to vector<4x8xf32>
    %16 = vector.extract_strided_slice %14 {offsets = [0, 8], sizes = [4, 1], strides = [1, 1]} : vector<4x64xf32> to vector<4x1xf32>
    %17 = vector.extract_strided_slice %14 {offsets = [0, 16], sizes = [4, 1], strides = [1, 1]} : vector<4x64xf32> to vector<4x1xf32>
    %18 = vector.extract_strided_slice %14 {offsets = [0, 24], sizes = [4, 3], strides = [1, 1]} : vector<4x64xf32> to vector<4x3xf32>
    %19 = vector.extract_strided_slice %14 {offsets = [0, 32], sizes = [4, 1], strides = [1, 1]} : vector<4x64xf32> to vector<4x1xf32>
    %20 = vector.extract_strided_slice %14 {offsets = [0, 40], sizes = [4, 8], strides = [1, 1]} : vector<4x64xf32> to vector<4x8xf32>
    %21 = vector.extract_strided_slice %14 {offsets = [0, 48], sizes = [4, 8], strides = [1, 1]} : vector<4x64xf32> to vector<4x8xf32>
    %22 = math.absf %20 : vector<4x8xf32>
    %cst_12 = arith.constant 0.000000e+00 : f32
    %23 = vector.broadcast %cst_12 : f32 to vector<4x8xf32>
    %24 = arith.subf %23, %22 : vector<4x8xf32>
    %25 = math.exp %24 : vector<4x8xf32>
    %cst_13 = arith.constant 0.000000e+00 : f32
    %26 = vector.broadcast %cst_13 : f32 to vector<4x8xf32>
    %27 = arith.cmpf oge, %20, %26 : vector<4x8xf32>
    %cst_14 = arith.constant 1.000000e+00 : f32
    %28 = vector.broadcast %cst_14 : f32 to vector<4x8xf32>
    %29 = arith.select %27, %28, %25 : vector<4x8xi1>, vector<4x8xf32>
    %cst_15 = arith.constant 1.000000e+00 : f32
    %30 = vector.broadcast %cst_15 : f32 to vector<4x8xf32>
    %31 = arith.addf %30, %25 : vector<4x8xf32>
    %32 = arith.divf %29, %31 : vector<4x8xf32>
    %c0_16 = arith.constant 0 : index
    %c0_17 = arith.constant 0 : index
    %33 = vector.load %arg6[%c0_16, %c0_17] : memref<4x8xf32, #tpu.memory_space<vmem>>, vector<4x8xf32>
    tpu.vector_store %arg6[%c0_16, %c0_17], %32 {strides = array<i32>} : memref<4x8xf32, #tpu.memory_space<vmem>>, vector<4x8xf32>,
    %c0_18 = arith.constant 0 : index
    %c0_19 = arith.constant 0 : index
    %34 = vector.load %arg7[%c0_18, %c0_19] : memref<4x8xf32, #tpu.memory_space<vmem>>, vector<4x8xf32>
    tpu.vector_store %arg7[%c0_18, %c0_19], %21 {strides = array<i32>} : memref<4x8xf32, #tpu.memory_space<vmem>>, vector<4x8xf32>,
    %cst_20 = arith.constant 0.000000e+00 : f32
    %35 = vector.broadcast %cst_20 : f32 to vector<4x1xf32>
    %36 = arith.maximumf %16, %35 : vector<4x1xf32>
    %37 = math.absf %16 : vector<4x1xf32>
    %cst_21 = arith.constant 0.000000e+00 : f32
    %38 = vector.broadcast %cst_21 : f32 to vector<4x1xf32>
    %39 = arith.subf %38, %37 : vector<4x1xf32>
    %40 = math.exp %39 : vector<4x1xf32>
    %cst_22 = arith.constant 1.000000e+00 : f32
    %41 = vector.broadcast %cst_22 : f32 to vector<4x1xf32>
    %42 = arith.addf %41, %40 : vector<4x1xf32>
    %43 = math.log %42 : vector<4x1xf32>
    %44 = arith.addf %36, %43 : vector<4x1xf32>
    %45 = math.absf %17 : vector<4x1xf32>
    %cst_23 = arith.constant 0.000000e+00 : f32
    %46 = vector.broadcast %cst_23 : f32 to vector<4x1xf32>
    %47 = arith.subf %46, %45 : vector<4x1xf32>
    %48 = math.exp %47 : vector<4x1xf32>
    %cst_24 = arith.constant 0.000000e+00 : f32
    %49 = vector.broadcast %cst_24 : f32 to vector<4x1xf32>
    %50 = arith.cmpf oge, %17, %49 : vector<4x1xf32>
    %cst_25 = arith.constant 1.000000e+00 : f32
    %51 = vector.broadcast %cst_25 : f32 to vector<4x1xf32>
    %52 = arith.select %50, %51, %48 : vector<4x1xi1>, vector<4x1xf32>
    %cst_26 = arith.constant 1.000000e+00 : f32
    %53 = vector.broadcast %cst_26 : f32 to vector<4x1xf32>
    %54 = arith.addf %53, %48 : vector<4x1xf32>
    %55 = arith.divf %52, %54 : vector<4x1xf32>
    %cst_27 = arith.constant 0.000000e+00 : f32
    %56 = vector.broadcast %cst_27 : f32 to vector<4x1xf32>
    %57 = arith.maximumf %19, %56 : vector<4x1xf32>
    %58 = math.absf %19 : vector<4x1xf32>
    %cst_28 = arith.constant 0.000000e+00 : f32
    %59 = vector.broadcast %cst_28 : f32 to vector<4x1xf32>
    %60 = arith.subf %59, %58 : vector<4x1xf32>
    %61 = math.exp %60 : vector<4x1xf32>
    %cst_29 = arith.constant 1.000000e+00 : f32
    %62 = vector.broadcast %cst_29 : f32 to vector<4x1xf32>
    %63 = arith.addf %62, %61 : vector<4x1xf32>
    %64 = math.log %63 : vector<4x1xf32>
    %65 = arith.addf %57, %64 : vector<4x1xf32>
    %cst_30 = arith.constant 1.000000e+00 : f32
    %66 = vector.broadcast %cst_30 : f32 to vector<4x1xf32>
    %67 = arith.addf %66, %65 : vector<4x1xf32>
    %cst_31 = arith.constant dense<0xFF800000> : vector<4xf32>
    %68 = vector.multi_reduction <maximumf>, %18, %cst_31 [1] : vector<4x3xf32> to vector<4xf32>
    %69 = vector.shape_cast %68 : vector<4xf32> to vector<4x1xf32>
    %70 = vector.broadcast %69 : vector<4x1xf32> to vector<4x3xf32>
    %71 = arith.subf %18, %70 : vector<4x3xf32>
    %72 = math.exp %71 : vector<4x3xf32>
    %cst_32 = arith.constant dense<0.000000e+00> : vector<4xf32>
    %73 = vector.multi_reduction <add>, %72, %cst_32 [1] : vector<4x3xf32> to vector<4xf32>
    %74 = vector.shape_cast %73 : vector<4xf32> to vector<4x1xf32>
    %75 = vector.broadcast %74 : vector<4x1xf32> to vector<4x3xf32>
    %76 = arith.divf %72, %75 : vector<4x3xf32>
    %c0_33 = arith.constant 0 : index
    %c0_34 = arith.constant 0 : index
    %c0_35 = arith.constant 0 : index
    %77 = vector.load %arg4[%c0_33, %c0_34, %c0_35] : memref<2x16x8xf32, #tpu.memory_space<vmem>>, vector<2x16x8xf32>
    %78 = vector.extract_strided_slice %77 {offsets = [0, 0, 0], sizes = [1, 16, 8], strides = [1, 1, 1]} : vector<2x16x8xf32> to vector<1x16x8xf32>
    %79 = vector.extract_strided_slice %77 {offsets = [0, 0, 0], sizes = [1, 16, 8], strides = [1, 1, 1]} : vector<2x16x8xf32> to vector<1x16x8xf32>
    %80 = vector.extract_strided_slice %77 {offsets = [1, 0, 0], sizes = [1, 16, 8], strides = [1, 1, 1]} : vector<2x16x8xf32> to vector<1x16x8xf32>
    %81 = vector.extract_strided_slice %77 {offsets = [1, 0, 0], sizes = [1, 16, 8], strides = [1, 1, 1]} : vector<2x16x8xf32> to vector<1x16x8xf32>
    %82 = tpu.concatenate %78, %79, %80, %81 in 0 : vector<1x16x8xf32>, vector<1x16x8xf32>, vector<1x16x8xf32>, vector<1x16x8xf32> -> vector<4x16x8xf32>
    %cst_36 = arith.constant 1.000000e-16 : f32
    %83 = vector.broadcast %cst_36 : f32 to vector<4x16x8xf32>
    %84 = arith.addf %82, %83 : vector<4x16x8xf32>
    %85 = arith.mulf %84, %84 : vector<4x16x8xf32>
    %cst_37 = arith.constant dense<0.000000e+00> : vector<4x16xf32>
    %86 = vector.multi_reduction <add>, %85, %cst_37 [2] : vector<4x16x8xf32> to vector<4x16xf32>
    %87 = math.sqrt %86 : vector<4x16xf32>
    %cst_38 = arith.constant 1.000000e-16 : f32
    %88 = vector.broadcast %cst_38 : f32 to vector<4x8xf32>
    %89 = arith.addf %15, %88 : vector<4x8xf32>
    %90 = arith.mulf %89, %89 : vector<4x8xf32>
    %cst_39 = arith.constant dense<0.000000e+00> : vector<4xf32>
    %91 = vector.multi_reduction <add>, %90, %cst_39 [1] : vector<4x8xf32> to vector<4xf32>
    %92 = vector.shape_cast %91 : vector<4xf32> to vector<4x1xf32>
    %93 = math.sqrt %92 : vector<4x1xf32>
    %94 = vector.shape_cast %89 : vector<4x8xf32> to vector<4x1x8xf32>
    %95 = vector.broadcast %94 : vector<4x1x8xf32> to vector<4x16x8xf32>
    %96 = arith.mulf %95, %84 : vector<4x16x8xf32>
    %cst_40 = arith.constant dense<0.000000e+00> : vector<4x16xf32>
    %97 = vector.multi_reduction <add>, %96, %cst_40 [2] : vector<4x16x8xf32> to vector<4x16xf32>
    %98 = vector.broadcast %93 : vector<4x1xf32> to vector<4x16xf32>
    %99 = arith.mulf %98, %87 : vector<4x16xf32>
    %cst_41 = arith.constant 9.99999993E-9 : f32
    %100 = vector.broadcast %cst_41 : f32 to vector<4x16xf32>
    %101 = arith.maximumf %99, %100 : vector<4x16xf32>
    %102 = arith.divf %97, %101 : vector<4x16xf32>
    %103 = vector.broadcast %44 : vector<4x1xf32> to vector<4x16xf32>
    %104 = arith.mulf %103, %102 : vector<4x16xf32>
    %cst_42 = arith.constant dense<0xFF800000> : vector<4xf32>
    %105 = vector.multi_reduction <maximumf>, %104, %cst_42 [1] : vector<4x16xf32> to vector<4xf32>
    %106 = vector.shape_cast %105 : vector<4xf32> to vector<4x1xf32>
    %107 = vector.broadcast %106 : vector<4x1xf32> to vector<4x16xf32>
    %108 = arith.subf %104, %107 : vector<4x16xf32>
    %109 = math.exp %108 : vector<4x16xf32>
    %cst_43 = arith.constant dense<0.000000e+00> : vector<4xf32>
    %110 = vector.multi_reduction <add>, %109, %cst_43 [1] : vector<4x16xf32> to vector<4xf32>
    %111 = vector.shape_cast %110 : vector<4xf32> to vector<4x1xf32>
    %112 = vector.broadcast %111 : vector<4x1xf32> to vector<4x16xf32>
    %113 = arith.divf %109, %112 : vector<4x16xf32>
    %114 = vector.broadcast %55 : vector<4x1xf32> to vector<4x16xf32>
    %115 = arith.mulf %114, %113 : vector<4x16xf32>
    %cst_44 = arith.constant 1.000000e+00 : f32
    %116 = vector.broadcast %cst_44 : f32 to vector<4x1xf32>
    %117 = arith.subf %116, %55 : vector<4x1xf32>
    %c0_45 = arith.constant 0 : index
    %c0_46 = arith.constant 0 : index
    %118 = vector.load %arg3[%c0_45, %c0_46] : memref<4x16xf32, #tpu.memory_space<vmem>>, vector<4x16xf32>
    %119 = vector.broadcast %117 : vector<4x1xf32> to vector<4x16xf32>
    %120 = arith.mulf %119, %118 : vector<4x16xf32>
    %121 = arith.addf %115, %120 : vector<4x16xf32>
    %122 = vector.extract_strided_slice %121 {offsets = [0, 15], sizes = [4, 1], strides = [1, 1]} : vector<4x16xf32> to vector<4x1xf32>
    %123 = vector.extract_strided_slice %121 {offsets = [0, 0], sizes = [4, 15], strides = [1, 1]} : vector<4x16xf32> to vector<4x15xf32>
    %124 = tpu.concatenate %122, %123 in 1 : vector<4x1xf32>, vector<4x15xf32> -> vector<4x16xf32>
    %125 = vector.extract_strided_slice %76 {offsets = [0, 0], sizes = [4, 1], strides = [1, 1]} : vector<4x3xf32> to vector<4x1xf32>
    %126 = vector.broadcast %125 : vector<4x1xf32> to vector<4x16xf32>
    %127 = arith.mulf %124, %126 : vector<4x16xf32>
    %128 = vector.extract_strided_slice %76 {offsets = [0, 1], sizes = [4, 1], strides = [1, 1]} : vector<4x3xf32> to vector<4x1xf32>
    %129 = vector.broadcast %128 : vector<4x1xf32> to vector<4x16xf32>
    %130 = arith.mulf %121, %129 : vector<4x16xf32>
    %131 = arith.addf %127, %130 : vector<4x16xf32>
    %132 = vector.extract_strided_slice %121 {offsets = [0, 1], sizes = [4, 15], strides = [1, 1]} : vector<4x16xf32> to vector<4x15xf32>
    %133 = vector.extract_strided_slice %121 {offsets = [0, 0], sizes = [4, 1], strides = [1, 1]} : vector<4x16xf32> to vector<4x1xf32>
    %134 = tpu.concatenate %132, %133 in 1 : vector<4x15xf32>, vector<4x1xf32> -> vector<4x16xf32>
    %135 = vector.extract_strided_slice %76 {offsets = [0, 2], sizes = [4, 1], strides = [1, 1]} : vector<4x3xf32> to vector<4x1xf32>
    %136 = vector.broadcast %135 : vector<4x1xf32> to vector<4x16xf32>
    %137 = arith.mulf %134, %136 : vector<4x16xf32>
    %138 = arith.addf %131, %137 : vector<4x16xf32>
    %cst_47 = arith.constant 1.000000e-30 : f32
    %139 = vector.broadcast %cst_47 : f32 to vector<4x16xf32>
    %140 = arith.maximumf %138, %139 : vector<4x16xf32>
    %141 = math.log %140 : vector<4x16xf32>
    %142 = vector.broadcast %67 : vector<4x1xf32> to vector<4x16xf32>
    %143 = arith.mulf %142, %141 : vector<4x16xf32>
    %144 = math.exp %143 : vector<4x16xf32>
    %cst_48 = arith.constant dense<0.000000e+00> : vector<4xf32>
    %145 = vector.multi_reduction <add>, %144, %cst_48 [1] : vector<4x16xf32> to vector<4xf32>
    %146 = vector.shape_cast %145 : vector<4xf32> to vector<4x1xf32>
    %cst_49 = arith.constant 1.000000e-16 : f32
    %147 = vector.broadcast %cst_49 : f32 to vector<4x1xf32>
    %148 = arith.addf %146, %147 : vector<4x1xf32>
    %149 = vector.broadcast %148 : vector<4x1xf32> to vector<4x16xf32>
    %150 = arith.divf %144, %149 : vector<4x16xf32>
    %c0_50 = arith.constant 0 : index
    %c0_51 = arith.constant 0 : index
    %151 = vector.load %arg5[%c0_50, %c0_51] : memref<4x16xf32, #tpu.memory_space<vmem>>, vector<4x16xf32>
    tpu.vector_store %arg5[%c0_50, %c0_51], %150 {strides = array<i32>} : memref<4x16xf32, #tpu.memory_space<vmem>>, vector<4x16xf32>,
    return
  }
}

</mosaic_0001>

<bundles_post_ra>
// kernel: ntm_write_head.1
= control target key start
LH: loop header
LB: loop body
LE: loop exit
PB: predicated region body
PF: predicated region fallthrough
CT: control target
= control target key end

     0   :  { %13 = vsyncpa [#allocation4], 0  ;;  %s1083_s0 = inlined_call_operand.vmem [shape: f32[2,32], index: 0, kind: input, shape index: {}]   ;;  %s1084_s1 = inlined_call_operand.vmem [shape: f32[32,128], index: 1, kind: input, shape index: {}]   ;;  %s1085_s2 = inlined_call_operand.vmem [shape: f32[1,128], index: 2, kind: input, shape index: {}]   ;;  %s1086_s3 = inlined_call_operand.vmem [shape: f32[4,16], index: 3, kind: input, shape index: {}]   ;;  %s1087_s4 = inlined_call_operand.vmem [shape: f32[2,16,8], index: 4, kind: input, shape index: {}]   ;;  %s1088_s5 = inlined_call_operand.vmem [shape: f32[4,16], index: 5, kind: output, shape index: {0}]   ;;  %s1089_s6 = inlined_call_operand.hbm [shape: f32[4,8], index: 6, kind: output, shape index: {1}]   ;;  %s1090_s7 = inlined_call_operand.hbm [shape: f32[4,8], index: 7, kind: output, shape index: {2}]  }
   0x1   :  { %v29_v0 = vld [vmem:[%s1084_s1 + $0x18] sm:$0xff]  ;;  %v28_v1 = vld [vmem:[%s1084_s1 + $0x10] sm:$0xff]  ;;  %v27_v2 = vld [vmem:[%s1084_s1 + $0x8] sm:$0xff] }
   0x2   :  { %50 = vmatpush.msra.mxu0 %v29_v0 }
   0x3   :  { %14 = vsyncpa [#allocation6], 0  ;;  %v26_v3 = vld [vmem:[%s1084_s1] sm:$0xff]  ;;  %vm34_vm0 = vcmask 261120   ;;  %v138_v5 = vld [vmem:[%s1087_s4 + $0x8] sm:$0xff]  ;;  %vm149_vm1 = vcmask 64512   ;;  %v275_v0 = vlaneseq }
   0x4   :  { %51 = vmatpush.msra.mxu0 %v28_v1  ;;  %v25_v4 = vld [vmem:[%s1083_s0] sm:$0x3]  ;;  %v140_v6 = vld [vmem:[%s1087_s4 + $0x18] sm:$0xff]  ;;  %v139_v7 = vld [vmem:[%s1087_s4 + $0x10] sm:$0xff]  ;;  %v882_v8 = vadd.f32 1e-16, %v138_v5 }
   0x5   :  { %v884_v9 = vadd.f32 1e-16, %v140_v6  ;;  %v890_v12 = vadd.f32 1e-16, %v139_v7  ;;  %v702_v17 = vld [vmem:[%s1085_s2] ss:$0 sm:$0xff] }
   0x6   :  { %52 = vmatpush.msra.mxu0 %v27_v2  ;;  %v146_v10 = vmul.f32 %v882_v8, %v882_v8  ;;  %vm58_vm2 = vcmask 516096   ;;  %vm65_vm3 = vcmask 517121   ;;  %s801_s17 = smov 64   ;;  %v137_v20 = vld [vmem:[%s1087_s4] sm:$0xff]  ;;  %vm95_vm4 = vcmask 60416   ;;  %s805_s2 = smov 104  }
   0x7   :  { %v148_v11 = vmul.f32 %v884_v9, %v884_v9  ;;  %v147_v15 = vmul.f32 %v890_v12, %v890_v12  ;;  %v903_v21 = vadd.f32 1e-16, %v137_v20  ;;  %s810_s21 = smov 127   ;;  %s811_s22 = smov 1  }
   0x8   :  { %53 = vmatpush.msra.mxu0 %v26_v3  ;;  %v153_v13 = vsel %vm149_vm1, %v146_v10, 0.0  ;;  %s812_s23 = smov 113   ;;  %s814_s24 = smov 88  }
   0x9   :  { %669 = vmatmul.msk.f32.vlgmr.msra.gmra.mxu0 %vm34_vm0, %v25_v4  ;;  %v159_v14 = vsel %vm149_vm1, %v148_v11, 0.0  ;;  %154 = vadd.xlane.f32.xlu1 %v153_v13  ;;  %v156_v16 = vsel %vm149_vm1, %v147_v15, 0.0  ;;  %v145_v22 = vmul.f32 %v903_v21, %v903_v21  ;;  %v948_v4 = vshrl.u32 %v275_v0, 7  ;;  %s815_s25 = smov 80   ;;  %s642_s28 = sshll.u32 %s1089_s6, 4  ;;  %s643_s28 = int_to_ptr.hbm [resolvable:$true] %s642_s28 }
   0xa   :  { %160 = vadd.xlane.f32.xlu2 %v159_v14  ;;  %s816_s29 = smov [#allocation3]   ;;  %s817_s8 = smov [#allocation5]  }
   0xb   :  { %v150_v23 = vsel %vm149_vm1, %v145_v22, 0.0  ;;  %690 = vset.pattern.permute.xlu0 %v948_v4  ;;  %688 = vset.pattern.permute.xlu2 %v948_v4  ;;  %s640_s30 = sshll.u32 %s816_s29, 4  ;;  %s651_s9 = sshll.u32 %s817_s8, 4  ;;  %s641_s30 = int_to_ptr.vmem [resolvable:$true] %s640_s30  ;;  %s652_s9 = int_to_ptr.vmem [resolvable:$true] %s651_s9 }
   0xc   :  { %687 = vset.pattern.permute.xlu1 %v948_v4  ;;  %s653_s12 = sshll.u32 %s1090_s7, 4  ;;  %s654_s12 = int_to_ptr.hbm [resolvable:$true] %s653_s12 }
  0x11   :  { %157 = vadd.xlane.f32.xlu1 %v156_v16 }
  0x7c   :  { %v932_v51 = vpop.xlane.xlu1 %154 }
  0x7d   :  { %v934_v52 = vpop.xlane.xlu2 %160  ;;  %vm181_vm10 = vcmp.eq.f32.partialorder %v932_v51, inf  ;;  %vm183_vm11 = vcmp.eq.f32.partialorder %v932_v51, 0.0 }
  0x7e   :  { %vm205_vm12 = vcmp.eq.f32.partialorder %v934_v52, inf  ;;  %vm207_vm15 = vcmp.eq.f32.partialorder %v934_v52, 0.0 }
  0x84   :  { %v936_v53 = vpop.xlane.xlu1 %157 }
  0x85   :  { %vm193_vm13 = vcmp.eq.f32.partialorder %v936_v53, inf  ;;  %vm195_vm0 = vcmp.eq.f32.partialorder %v936_v53, 0.0 }
  0x86   :  { %v55_v18 = vpop.f32.mrf.mxu0 }
  0x87   :  { %v56_v19 = vadd.f32 %v702_v17, %v55_v18 }
  0x89   :  { %61 = vrot.lane.b32.xlu0 %v56_v19, %s801_s17  ;;  %59 = vst.msk [vmem:[#allocation2] sm:$0x1] %vm58_vm2, %v56_v19 }
  0x8a   :  { %66 = vst.msk [vmem:[#allocation2 + $0x1] sm:$0x2] %vm65_vm3, %v56_v19 }
  0xb3   :  { %151 = vadd.xlane.f32.xlu0 %v150_v23 }
  0xfb   :  { %v62_v24 = vpop.permute.xlu0 %61 }
  0xfc   :  { %64 = vst.msk [vmem:[#allocation2 + $0x1] sm:$0x1] %vm58_vm2, %v62_v24 }
  0xfd   :  { %67 = vst.msk [vmem:[#allocation2 + $0x2] sm:$0x2] %vm65_vm3, %v62_v24  ;;  %vm280_vm3 = vcmask 130112  }
 0x104   :  { %v908_v25 = vld [vmem:[#allocation2] sm:$0xf] }
 0x105   :  { %v911_v26 = vadd.f32 1e-16, %v908_v25  ;;  %v69_v27 = vand.u32 2147483647, %v908_v25  ;;  %vm73_vm8 = vcmp.ge.f32.partialorder %v908_v25, 0.0 }
 0x107   :  { %v211_v28 = vmul.f32 %v911_v26, %v911_v26  ;;  %v231_v29 = vperm.slane %v911_v26, 0  ;;  %v70_v32 = vsub.f32 0.0, %v69_v27 }
 0x109   :  { %v212_v30 = vsel %vm95_vm4, %v211_v28, 0.0  ;;  %v239_v31 = vmul.f32 %v231_v29, %v903_v21  ;;  %v240_v34 = vmul.f32 %v231_v29, %v882_v8  ;;  %v71_v35 = vmul.f32 1.442695, %v70_v32 }
 0x10a   :  { %213 = vadd.xlane.f32.xlu2 %v212_v30  ;;  %v184_v28 = vand.u32 2147483648, %v932_v51  ;;  %v208_v29 = vand.u32 2147483648, %v934_v52  ;;  %v965_v30 = vand.u32 127, %v275_v0  ;;  %v196_v32 = vand.u32 2147483648, %v936_v53 }
 0x10b   :  { %v247_v33 = vsel %vm149_vm1, %v239_v31, 0.0  ;;  %703 = vpow2.f32 %v71_v35  ;;  %v250_v36 = vsel %vm149_vm1, %v240_v34, 0.0 }
 0x10c   :  { %248 = vadd.xlane.f32.xlu1 %v247_v33 }
 0x111   :  { %v704_v37 = vpop.eup %703 }
 0x112   :  { %251 = vadd.xlane.f32.xlu2 %v250_v36  ;;  %v922_v38 = vadd.f32 1.0, %v704_v37  ;;  %v74_v48 = vsel %vm73_vm8, 1.0, %v704_v37 }
 0x114   :  { %705 = vrcp.f32 %v922_v38  ;;  %v87_v43 = vand.u32 2147483648, %v922_v38  ;;  %v85_v44 = vand.u32 2147483647, %v922_v38  ;;  %vm81_vm6 = vweird.f32 %v922_v38 }
 0x115   :  { %707 = vrsqrt.f32 %v932_v51 }
 0x116   :  { %v88_v46 = vor.u32 1.1754944e-38, %v87_v43  ;;  %vm86_vm9 = vcmp.eq.f32.partialorder %v85_v44, 8.507059e+37  ;;  %709 = vrsqrt.f32 %v934_v52 }
 0x117   :  { %711 = vrsqrt.f32 %v936_v53 }
 0x11a   :  { %v706_v39 = vpop.eup %705 }
 0x11b   :  { %v77_v40 = vmul.f32 %v706_v39, %v922_v38  ;;  %vm82_vm5 = vweird.f32 %v706_v39  ;;  %v708_v55 = vpop.eup %707 }
 0x11c   :  { %vm83_vm7 = vmor %vm81_vm6, %vm82_vm5  ;;  %v710_v56 = vpop.eup %709  ;;  %v175_v59 = vmul.f32 %v708_v55, %v932_v51  ;;  %vm286_vm5 = vcmask 1042434   ;;  %vm288_vm6 = vcmask 1043459  }
 0x11d   :  { %v78_v41 = vsub.f32 1.0, %v77_v40  ;;  %v712_v57 = vpop.eup %711  ;;  %v199_v60 = vmul.f32 %v710_v56, %v934_v52  ;;  %v978_v40 = vadd.s32 4294967288, %v965_v30 }
 0x11e   :  { %v187_v61 = vmul.f32 %v712_v57, %v936_v53  ;;  %v176_v63 = vmul.f32 %v708_v55, %v175_v59 }
 0x11f   :  { %v79_v42 = vmul.f32 %v706_v39, %v78_v41  ;;  %v200_v1 = vmul.f32 %v710_v56, %v199_v60 }
 0x120   :  { %v188_v2 = vmul.f32 %v712_v57, %v187_v61  ;;  %v177_v5 = vmul.f32 0.5, %v176_v63 }
 0x121   :  { %v80_v45 = vadd.f32 %v706_v39, %v79_v42  ;;  %v201_v6 = vmul.f32 0.5, %v200_v1 }
 0x122   :  { %v189_v7 = vmul.f32 0.5, %v188_v2  ;;  %v178_v11 = vsub.f32 1.5, %v177_v5 }
 0x123   :  { %v84_v47 = vsel %vm83_vm7, %v706_v39, %v80_v45  ;;  %v202_v13 = vsub.f32 1.5, %v201_v6  ;;  %v228_v6 = vrot.slane %v911_v26, 1 }
 0x124   :  { %v89_v49 = vsel %vm86_vm9, %v88_v46, %v84_v47  ;;  %v190_v14 = vsub.f32 1.5, %v189_v7  ;;  %v179_v16 = vmul.f32 %v708_v55, %v178_v11 }
 0x125   :  { %v930_v50 = vmul.f32 %v89_v49, %v74_v48  ;;  %v203_v17 = vmul.f32 %v710_v56, %v202_v13  ;;  %v232_v7 = vperm.slane %v228_v6, 0 }
 0x126   :  { %v939_v54 = vpop.xlane.xlu0 %151  ;;  %v191_v18 = vmul.f32 %v712_v57, %v190_v14  ;;  %v180_v20 = vmul.f32 %v179_v16, %v932_v51 }
 0x127   :  { %713 = vrsqrt.f32 %v939_v54  ;;  %v204_v23 = vmul.f32 %v203_v17, %v934_v52  ;;  %vm169_vm14 = vcmp.eq.f32.partialorder %v939_v54, inf  ;;  %v172_v33 = vand.u32 2147483648, %v939_v54 }
 0x128   :  { %v192_v24 = vmul.f32 %v191_v18, %v936_v53  ;;  %v182_v31 = vsel %vm181_vm10, %v932_v51, %v180_v20  ;;  %vm171_vm2 = vcmp.eq.f32.partialorder %v939_v54, 0.0  ;;  %v241_v11 = vmul.f32 %v232_v7, %v903_v21 }
 0x129   :  { %v206_v34 = vsel %vm205_vm12, %v934_v52, %v204_v23  ;;  %v185_v39 = vsel %vm183_vm11, %v184_v28, %v182_v31  ;;  %v242_v16 = vmul.f32 %v232_v7, %v882_v8 }
 0x12a   :  { %v194_v35 = vsel %vm193_vm13, %v936_v53, %v192_v24  ;;  %v209_v41 = vsel %vm207_vm15, %v208_v29, %v206_v34  ;;  %v279_v47 = vperm.slane %v185_v39, %v978_v40  ;;  %v253_v14 = vsel %vm149_vm1, %v241_v11, 0.0 }
 0x12b   :  { %v197_v42 = vsel %vm195_vm0, %v196_v32, %v194_v35  ;;  %v283_v49 = vperm.slane %v209_v41, %v978_v40  ;;  %v256_v17 = vsel %vm149_vm1, %v242_v16, 0.0 }
 0x12c   :  { %v282_v48 = vperm.slane %v197_v42, %v965_v30 }
 0x12d   :  { %v714_v58 = vpop.eup %713 }
 0x12e   :  { %v163_v62 = vmul.f32 %v714_v58, %v939_v54 }
 0x130   :  { %v164_v3 = vmul.f32 %v714_v58, %v163_v62 }
 0x132   :  { %v165_v10 = vmul.f32 0.5, %v164_v3  ;;  %v303_v3 = vadd.s32 8, %v948_v4 }
 0x134   :  { %v166_v15 = vsub.f32 1.5, %v165_v10  ;;  %v229_v10 = vrot.slane %v911_v26, 2 }
 0x136   :  { %v167_v19 = vmul.f32 %v714_v58, %v166_v15  ;;  %v233_v13 = vperm.slane %v229_v10, 0 }
 0x138   :  { %v168_v27 = vmul.f32 %v167_v19, %v939_v54  ;;  %v243_v15 = vmul.f32 %v233_v13, %v890_v12  ;;  %v244_v18 = vmul.f32 %v233_v13, %v884_v9  ;;  %v230_v19 = vrot.slane %v911_v26, 3 }
 0x13a   :  { %v170_v36 = vsel %vm169_vm14, %v939_v54, %v168_v27  ;;  %v284_v54 = vsel %vm280_vm3, %v283_v49, %v282_v48  ;;  %v259_v4 = vsel %vm149_vm1, %v243_v15, 0.0  ;;  %v262_v21 = vsel %vm149_vm1, %v244_v18, 0.0 }
 0x13b   :  { %v173_v43 = vsel %vm171_vm2, %v172_v33, %v170_v36  ;;  %v234_v20 = vperm.slane %v230_v19, 0  ;;  %v802_v27 = vmov 0  }
 0x13c   :  { %v277_v46 = vperm.slane %v173_v43, %v965_v30 }
 0x13d   :  { %v245_v26 = vmul.f32 %v234_v20, %v890_v12 }
 0x13e   :  { %v281_v53 = vsel %vm280_vm3, %v279_v47, %v277_v46 }
 0x13f   :  { %v287_v57 = vsel %vm286_vm5, %v284_v54, %v281_v53  ;;  %v265_v29 = vsel %vm149_vm1, %v245_v26, 0.0 }
 0x140   :  { %v289_v61 = vsel %vm288_vm6, %v284_v54, %v287_v57 }
 0x17d   :  { %v214_v22 = vpop.xlane.xlu2 %213 }
 0x17e   :  { %715 = vrsqrt.f32 %v214_v22  ;;  %vm222_vm7 = vcmp.eq.f32.partialorder %v214_v22, inf  ;;  %v225_v58 = vand.u32 2147483648, %v214_v22  ;;  %vm224_vm8 = vcmp.eq.f32.partialorder %v214_v22, 0.0 }
 0x17f   :  { %v249_v24 = vpop.xlane.xlu1 %248 }
 0x184   :  { %v716_v37 = vpop.eup %715 }
 0x185   :  { %v216_v44 = vmul.f32 %v716_v37, %v214_v22  ;;  %v1003_v28 = vpop.xlane.xlu2 %251 }
 0x187   :  { %v217_v45 = vmul.f32 %v716_v37, %v216_v44 }
 0x189   :  { %v218_v52 = vmul.f32 0.5, %v217_v45 }
 0x18b   :  { %v219_v51 = vsub.f32 1.5, %v218_v52 }
 0x18d   :  { %v220_v55 = vmul.f32 %v716_v37, %v219_v51 }
 0x18f   :  { %v221_v56 = vmul.f32 %v220_v55, %v214_v22 }
 0x191   :  { %v223_v59 = vsel %vm222_vm7, %v214_v22, %v221_v56  ;;  %v246_v22 = vmul.f32 %v234_v20, %v884_v9 }
 0x192   :  { %v226_v60 = vsel %vm224_vm8, %v225_v58, %v223_v59 }
 0x193   :  { %v291_v62 = vmul.f32 %v289_v61, %v226_v60  ;;  %v268_v23 = vsel %vm149_vm1, %v246_v22, 0.0 }
 0x195   :  { %v292_v63 = vmax.f32 %v291_v62, 1e-08 }
 0x197   :  { %v333_v0 = vperm.slane %v292_v63, 3  ;;  %v307_v1 = vperm.slane %v292_v63, 1  ;;  %v294_v2 = vperm.slane %v292_v63, 0  ;;  %v320_v5 = vperm.slane %v292_v63, 2 }
 0x199   :  { %338 = vperm.xlu0 %690, %v333_v0   ;;  %312 = vperm.xlu2 %688, %v307_v1  }
 0x19a   :  { %299 = vperm.xlu1 %687, %v294_v2  }
 0x1a1   :  { %325 = vperm.xlu2 %688, %v320_v5   ;;  %694 = vset.pattern.permute.xlu0 %v802_v27 }
 0x1a2   :  { %689 = vset.pattern.permute.xlu1 %v303_v3 }
 0x1a9   :  { %691 = vset.pattern.permute.xlu2 %v303_v3 }
 0x1aa   :  { %318 = vperm.xlu1 %689, %v307_v1  }
 0x1b2   :  { %331 = vperm.xlu1 %689, %v320_v5  }
 0x1ba   :  { %693 = vset.pattern.permute.xlu1 %v802_v27 }
 0x1c3   :  { %254 = vadd.xlane.f32.xlu0 %v253_v14 }
 0x1ca   :  { %260 = vadd.xlane.f32.xlu2 %v259_v4 }
 0x1dc   :  { %257 = vadd.xlane.f32.xlu1 %v256_v17 }
 0x1e2   :  { %305 = vperm.xlu2 %691, %v294_v2  }
 0x1e4   :  { %263 = vadd.xlane.f32.xlu1 %v262_v21 }
 0x1ea   :  { %344 = vperm.xlu2 %691, %v333_v0  }
 0x1ec   :  { %269 = vadd.xlane.f32.xlu1 %v268_v23 }
 0x1f2   :  { %692 = vset.pattern.permute.xlu2 %v802_v27 }
 0x1f3   :  { %v313_v32 = vpop.permute.xlu2 %312 }
 0x1f4   :  { %v395_v52 = vand.u32 2147483648, %v313_v32  ;;  %vm389_vm13 = vweird.f32 %v313_v32  ;;  %v393_v51 = vand.u32 2147483647, %v313_v32 }
 0x1f6   :  { %v396_v54 = vor.u32 1.1754944e-38, %v395_v52  ;;  %vm394_vm15 = vcmp.eq.f32.partialorder %v393_v51, 8.507059e+37 }
 0x1fb   :  { %v1008_v55 = vpop.permute.xlu2 %325 }
 0x1fc   :  { %v423_v51 = vand.u32 2147483647, %v1008_v55 }
 0x20b   :  { %v1006_v47 = vpop.permute.xlu0 %338 }
 0x20c   :  { %v300_v8 = vpop.permute.xlu1 %299 }
 0x20d   :  { %717 = vrcp.f32 %v300_v8  ;;  %v365_v37 = vand.u32 2147483648, %v300_v8  ;;  %vm359_vm10 = vweird.f32 %v300_v8  ;;  %v363_v39 = vand.u32 2147483647, %v300_v8 }
 0x20e   :  { %719 = vrcp.f32 %v313_v32 }
 0x20f   :  { %v366_v42 = vor.u32 1.1754944e-38, %v365_v37  ;;  %vm364_vm12 = vcmp.eq.f32.partialorder %v363_v39, 8.507059e+37 }
 0x213   :  { %v718_v31 = vpop.eup %717  ;;  %266 = vadd.xlane.f32.xlu2 %v265_v29 }
 0x214   :  { %v355_v9 = vmul.f32 %v718_v31, %v300_v8  ;;  %vm360_vm9 = vweird.f32 %v718_v31  ;;  %v720_v36 = vpop.eup %719 }
 0x215   :  { %vm361_vm11 = vmor %vm359_vm10, %vm360_vm9  ;;  %v385_v41 = vmul.f32 %v720_v36, %v313_v32  ;;  %vm390_vm1 = vweird.f32 %v720_v36 }
 0x216   :  { %v356_v33 = vsub.f32 1.0, %v355_v9  ;;  %vm391_vm14 = vmor %vm389_vm13, %vm390_vm1 }
 0x217   :  { %v386_v44 = vsub.f32 1.0, %v385_v41 }
 0x218   :  { %v357_v34 = vmul.f32 %v718_v31, %v356_v33 }
 0x219   :  { %v387_v46 = vmul.f32 %v720_v36, %v386_v44 }
 0x21a   :  { %v358_v35 = vadd.f32 %v718_v31, %v357_v34 }
 0x21b   :  { %v388_v49 = vadd.f32 %v720_v36, %v387_v46 }
 0x21c   :  { %v362_v12 = vsel %vm361_vm11, %v718_v31, %v358_v35  ;;  %v319_v48 = vpop.permute.xlu1 %318 }
 0x21d   :  { %v367_v43 = vsel %vm364_vm12, %v366_v42, %v362_v12  ;;  %721 = vrcp.f32 %v319_v48  ;;  %v392_v53 = vsel %vm391_vm14, %v720_v36, %v388_v49  ;;  %v410_v10 = vand.u32 2147483648, %v319_v48 }
 0x21e   :  { %v368_v45 = vmul.f32 %v367_v43, %v249_v24  ;;  %v397_v57 = vsel %vm394_vm15, %v396_v54, %v392_v53  ;;  %vm404_vm2 = vweird.f32 %v319_v48  ;;  %v408_v11 = vand.u32 2147483647, %v319_v48 }
 0x21f   :  { %v411_v18 = vor.u32 1.1754944e-38, %v410_v10  ;;  %v453_v10 = vand.u32 2147483647, %v1006_v47 }
 0x220   :  { %vm409_vm8 = vcmp.eq.f32.partialorder %v408_v11, 8.507059e+37 }
 0x223   :  { %v722_v60 = vpop.eup %721 }
 0x224   :  { %v332_v59 = vpop.permute.xlu1 %331  ;;  %v400_v61 = vmul.f32 %v722_v60, %v319_v48  ;;  %vm405_vm0 = vweird.f32 %v722_v60  ;;  %v425_v48 = vand.u32 2147483648, %v1008_v55 }
 0x225   :  { %723 = vrcp.f32 %v332_v59  ;;  %vm406_vm7 = vmor %vm404_vm2, %vm405_vm0  ;;  %v440_v26 = vand.u32 2147483648, %v332_v59  ;;  %vm434_vm11 = vweird.f32 %v332_v59  ;;  %v438_v31 = vand.u32 2147483647, %v332_v59 }
 0x226   :  { %v401_v63 = vsub.f32 1.0, %v400_v61  ;;  %725 = vrcp.f32 %v1008_v55  ;;  %vm419_vm2 = vweird.f32 %v1008_v55 }
 0x227   :  { %v441_v39 = vor.u32 1.1754944e-38, %v440_v26  ;;  %vm439_vm0 = vcmp.eq.f32.partialorder %v438_v31, 8.507059e+37 }
 0x228   :  { %v402_v2 = vmul.f32 %v722_v60, %v401_v63 }
 0x22a   :  { %v403_v7 = vadd.f32 %v722_v60, %v402_v2 }
 0x22b   :  { %488 = vperm.xlu2 %692, %v368_v45   ;;  %v724_v0 = vpop.eup %723 }
 0x22c   :  { %v430_v1 = vmul.f32 %v724_v0, %v332_v59  ;;  %v1013_v5 = vpop.eup %725  ;;  %v407_v15 = vsel %vm406_vm7, %v722_v60, %v403_v7  ;;  %vm435_vm9 = vweird.f32 %v724_v0  ;;  %v455_v7 = vand.u32 2147483648, %v1006_v47 }
 0x22d   :  { %v415_v13 = vmul.f32 %v1013_v5, %v1008_v55  ;;  %v412_v20 = vsel %vm409_vm8, %v411_v18, %v407_v15  ;;  %vm1018_vm1 = vmor %vm434_vm11, %vm435_vm9  ;;  %vm420_vm15 = vweird.f32 %v1013_v5  ;;  %vm424_vm11 = vcmp.eq.f32.partialorder %v423_v51, 8.507059e+37 }
 0x22e   :  { %v431_v6 = vsub.f32 1.0, %v430_v1  ;;  %vm421_vm8 = vmor %vm419_vm2, %vm420_vm15  ;;  %v456_v11 = vor.u32 1.1754944e-38, %v455_v7  ;;  %vm454_vm15 = vcmp.eq.f32.partialorder %v453_v10, 8.507059e+37  ;;  %v102_v18 = vmax.f32 %v908_v25, 0.0 }
 0x22f   :  { %v416_v19 = vsub.f32 1.0, %v415_v13  ;;  %vm285_vm2 = vcmask 1041409  }
 0x230   :  { %v432_v4 = vmul.f32 %v724_v0, %v431_v6 }
 0x231   :  { %v417_v9 = vmul.f32 %v1013_v5, %v416_v19 }
 0x232   :  { %v433_v8 = vadd.f32 %v724_v0, %v432_v4 }
 0x233   :  { %v418_v42 = vadd.f32 %v1013_v5, %v417_v9 }
 0x234   :  { %v437_v36 = vsel %vm1018_vm1, %v724_v0, %v433_v8 }
 0x235   :  { %v442_v44 = vsel %vm439_vm0, %v441_v39, %v437_v36  ;;  %vm107_vm0 = vcmask 216256  }
 0x236   :  { %v255_v56 = vpop.xlane.xlu0 %254 }
 0x237   :  { %v398_v58 = vmul.f32 %v397_v57, %v255_v56  ;;  %v422_v56 = vsel %vm421_vm8, %v1013_v5, %v418_v42  ;;  %vm118_vm8 = vcmask 19456  }
 0x239   :  { %494 = vperm.xlu0 %694, %v398_v58  }
 0x23d   :  { %v1010_v62 = vpop.xlane.xlu2 %260 }
 0x245   :  { %v306_v3 = vpop.permute.xlu2 %305 }
 0x246   :  { %727 = vrcp.f32 %v306_v3  ;;  %v380_v23 = vand.u32 2147483648, %v306_v3  ;;  %v378_v29 = vand.u32 2147483647, %v306_v3  ;;  %vm374_vm12 = vweird.f32 %v306_v3 }
 0x248   :  { %v381_v35 = vor.u32 1.1754944e-38, %v380_v23  ;;  %vm379_vm14 = vcmp.eq.f32.partialorder %v378_v29, 8.507059e+37 }
 0x24c   :  { %v728_v14 = vpop.eup %727 }
 0x24d   :  { %v370_v16 = vmul.f32 %v728_v14, %v306_v3  ;;  %v345_v17 = vpop.permute.xlu2 %344  ;;  %vm375_vm10 = vweird.f32 %v728_v14 }
 0x24e   :  { %729 = vrcp.f32 %v345_v17  ;;  %vm376_vm13 = vmor %vm374_vm12, %vm375_vm10  ;;  %v470_v52 = vand.u32 2147483648, %v345_v17  ;;  %v468_v54 = vand.u32 2147483647, %v345_v17  ;;  %vm464_vm9 = vweird.f32 %v345_v17 }
 0x24f   :  { %v371_v21 = vsub.f32 1.0, %v370_v16  ;;  %v258_v22 = vpop.xlane.xlu1 %257  ;;  %731 = vrcp.f32 %v1006_v47  ;;  %v108_v16 = vsel %vm107_vm0, %v908_v25, -inf }
 0x250   :  { %v413_v24 = vmul.f32 %v412_v20, %v258_v22  ;;  %v471_v58 = vor.u32 1.1754944e-38, %v470_v52  ;;  %vm469_vm12 = vcmp.eq.f32.partialorder %v468_v54, 8.507059e+37  ;;  %733 = vlog2.f32 %v922_v38 }
 0x251   :  { %v372_v27 = vmul.f32 %v728_v14, %v371_v21  ;;  %v804_v22 = vmov 16  }
 0x252   :  { %497 = vperm.xlu2 %692, %v413_v24   ;;  %696 = vset.pattern.permute.xlu0 %v804_v22 }
 0x253   :  { %v373_v33 = vadd.f32 %v728_v14, %v372_v27 }
 0x254   :  { %v730_v34 = vpop.eup %729 }
 0x255   :  { %v460_v37 = vmul.f32 %v730_v34, %v345_v17  ;;  %v377_v41 = vsel %vm376_vm13, %v728_v14, %v373_v33  ;;  %vm465_vm7 = vweird.f32 %v730_v34  ;;  %v732_v1 = vpop.eup %731  ;;  %vm449_vm13 = vweird.f32 %v1006_v47 }
 0x256   :  { %v382_v12 = vsel %vm379_vm14, %v381_v35, %v377_v41  ;;  %vm466_vm10 = vmor %vm464_vm9, %vm465_vm7  ;;  %v445_v2 = vmul.f32 %v732_v1, %v1006_v47  ;;  %vm450_vm1 = vweird.f32 %v732_v1  ;;  %v734_v4 = vpop.eup %733  ;;  %v803_v47 = vmov 8  }
 0x257   :  { %v461_v43 = vsub.f32 1.0, %v460_v37  ;;  %v264_v45 = vpop.xlane.xlu1 %263  ;;  %v383_v46 = vmul.f32 %v382_v12, %v1003_v28  ;;  %v426_v28 = vor.u32 1.1754944e-38, %v425_v48  ;;  %vm451_vm14 = vmor %vm449_vm13, %vm450_vm1  ;;  %v104_v17 = vmul.f32 0.6931472, %v734_v4 }
 0x258   :  { %v443_v49 = vmul.f32 %v442_v44, %v264_v45  ;;  %v446_v3 = vsub.f32 1.0, %v445_v2  ;;  %vm528_vm7 = vcmask 125952   ;;  %vm574_vm13 = vcmask 7168  }
 0x259   :  { %491 = vperm.xlu1 %693, %v383_v46   ;;  %v462_v53 = vmul.f32 %v730_v34, %v461_v43  ;;  %v427_v60 = vsel %vm424_vm11, %v426_v28, %v422_v56  ;;  %v1042_v19 = vadd.f32 %v104_v17, %v102_v18 }
 0x25a   :  { %503 = vperm.xlu2 %692, %v443_v49   ;;  %v428_v61 = vmul.f32 %v427_v60, %v1010_v62  ;;  %v447_v5 = vmul.f32 %v732_v1, %v446_v3  ;;  %v806_v60 = vmov 24  }
 0x25b   :  { %v463_v57 = vadd.f32 %v730_v34, %v462_v53 }
 0x25c   :  { %v448_v6 = vadd.f32 %v732_v1, %v447_v5 }
 0x25d   :  { %v467_v59 = vsel %vm466_vm10, %v730_v34, %v463_v57 }
 0x25e   :  { %v472_v55 = vsel %vm469_vm12, %v471_v58, %v467_v59  ;;  %v452_v62 = vsel %vm451_vm14, %v732_v1, %v448_v6  ;;  %v558_v59 = vsub.f32 1.0, %v930_v50  ;;  %vm594_vm14 = vcmask 121856  }
 0x25f   :  { %v270_v63 = vpop.xlane.xlu1 %269  ;;  %v457_v13 = vsel %vm454_vm15, %v456_v11, %v452_v62 }
 0x260   :  { %v473_v0 = vmul.f32 %v472_v55, %v270_v63  ;;  %v807_v55 = vmov 25   ;;  %v808_v63 = vmov 32  }
 0x261   :  { %500 = vperm.xlu1 %693, %v428_v61  }
 0x262   :  { %509 = vperm.xlu2 %692, %v473_v0  }
 0x26a   :  { %697 = vset.pattern.permute.xlu2 %v804_v22  ;;  %v559_v22 = vld [vmem:[%s1086_s3] sm:$0xf]  ;;  %s813_s3 = smov 15  }
 0x286   :  { %v267_v14 = vpop.xlane.xlu2 %266 }
 0x287   :  { %v458_v15 = vmul.f32 %v457_v13, %v267_v14 }
 0x289   :  { %506 = vperm.xlu1 %693, %v458_v15  }
 0x28b   :  { %109 = vmax.xlane.f32.xlu2 %v108_v16 }
 0x28e   :  { %v489_v38 = vpop.permute.xlu2 %488 }
 0x28f   :  { %v511_v9 = vperm.slane %v489_v38, %v965_v30 }
 0x291   :  { %695 = vset.pattern.permute.xlu1 %v803_v47 }
 0x292   :  { %476 = vperm.xlu1 %695, %v1042_v19  }
 0x29a   :  { %698 = vset.pattern.permute.xlu1 %v806_v60 }
 0x2ab   :  { %v495_v27 = vpop.permute.xlu0 %494 }
 0x2ac   :  { %v498_v21 = vpop.permute.xlu2 %497  ;;  %v514_v32 = vperm.slane %v495_v27, %v965_v30  ;;  %v809_v27 = vmov 26  }
 0x2ad   :  { %v515_v33 = vperm.slane %v498_v21, %v978_v40 }
 0x2af   :  { %v516_v42 = vsel %vm280_vm3, %v515_v33, %v514_v32  ;;  %v106_v32 = vadd.f32 1.0, %v1042_v19 }
 0x2b4   :  { %v504_v23 = vpop.permute.xlu2 %503 }
 0x2b5   :  { %v518_v35 = vperm.slane %v504_v23, %v978_v40 }
 0x2bc   :  { %v510_v8 = vpop.permute.xlu2 %509 }
 0x2bd   :  { %v521_v37 = vperm.slane %v510_v8, %v978_v40 }
 0x2cb   :  { %v492_v20 = vpop.permute.xlu1 %491 }
 0x2cc   :  { %v512_v26 = vperm.slane %v492_v20, %v978_v40 }
 0x2ce   :  { %v513_v39 = vsel %vm280_vm3, %v512_v26, %v511_v9 }
 0x2cf   :  { %v523_v45 = vsel %vm285_vm2, %v516_v42, %v513_v39 }
 0x2d3   :  { %v501_v24 = vpop.permute.xlu1 %500 }
 0x2d4   :  { %v517_v31 = vperm.slane %v501_v24, %v965_v30 }
 0x2d6   :  { %v519_v12 = vsel %vm280_vm3, %v518_v35, %v517_v31 }
 0x2fb   :  { %v507_v29 = vpop.permute.xlu1 %506 }
 0x2fc   :  { %v520_v34 = vperm.slane %v507_v29, %v965_v30  ;;  %v524_v30 = vsel %vm286_vm5, %v519_v12, %v523_v45 }
 0x2fe   :  { %v110_v36 = vpop.xlane.xlu2 %109  ;;  %v522_v44 = vsel %vm280_vm3, %v521_v37, %v520_v34 }
 0x2ff   :  { %v111_v41 = vsub.f32 %v908_v25, %v110_v36  ;;  %v525_v46 = vsel %vm288_vm6, %v522_v44, %v524_v30 }
 0x301   :  { %v112_v43 = vmul.f32 1.442695, %v111_v41 }
 0x303   :  { %735 = vpow2.f32 %v112_v43 }
 0x304   :  { %v477_v48 = vpop.permute.xlu1 %476 }
 0x305   :  { %v527_v40 = vmul.f32 %v525_v46, %v477_v48 }
 0x307   :  { %v529_v49 = vsel %vm528_vm7, %v527_v40, -inf }
 0x308   :  { %530 = vmax.xlane.f32.xlu0 %v529_v49 }
 0x309   :  { %v736_v52 = vpop.eup %735 }
 0x30a   :  { %115 = vrot.lane.b32.xlu1 %v736_v52, %s805_s2 }
 0x31c   :  { %554 = vperm.xlu0 %696, %v930_v50  }
 0x324   :  { %701 = vset.pattern.permute.xlu0 %v808_v63 }
 0x37b   :  { %v531_v51 = vpop.xlane.xlu0 %530 }
 0x37c   :  { %v532_v53 = vsub.f32 %v527_v40, %v531_v51  ;;  %v116_v54 = vpop.permute.xlu1 %115 }
 0x37d   :  { %v119_v56 = vsel %vm118_vm8, %v116_v54, 0.0 }
 0x37e   :  { %v533_v57 = vmul.f32 1.442695, %v532_v53  ;;  %120 = vadd.xlane.f32.xlu2 %v119_v56 }
 0x380   :  { %737 = vpow2.f32 %v533_v57 }
 0x386   :  { %v738_v28 = vpop.eup %737 }
 0x387   :  { %v535_v58 = vsel %vm528_vm7, %v738_v28, 0.0 }
 0x388   :  { %536 = vadd.xlane.f32.xlu1 %v535_v58 }
 0x38e   :  { %v555_v26 = vpop.permute.xlu0 %554 }
 0x396   :  { %562 = vperm.xlu2 %697, %v558_v59  }
 0x39e   :  { %699 = vset.pattern.permute.xlu2 %v807_v55 }
 0x3f1   :  { %v121_v61 = vpop.xlane.xlu2 %120 }
 0x3f2   :  { %739 = vrcp.f32 %v121_v61  ;;  %v133_v5 = vand.u32 2147483648, %v121_v61  ;;  %v131_v7 = vand.u32 2147483647, %v121_v61  ;;  %vm127_vm5 = vweird.f32 %v121_v61 }
 0x3f4   :  { %v134_v62 = vor.u32 1.1754944e-38, %v133_v5  ;;  %vm132_vm9 = vcmp.eq.f32.partialorder %v131_v7, 8.507059e+37 }
 0x3f8   :  { %v740_v0 = vpop.eup %739 }
 0x3f9   :  { %v123_v1 = vmul.f32 %v740_v0, %v121_v61  ;;  %vm128_vm3 = vweird.f32 %v740_v0  ;;  %v563_v23 = vpop.permute.xlu2 %562 }
 0x3fa   :  { %vm129_vm6 = vmor %vm127_vm5, %vm128_vm3  ;;  %v565_v29 = vmul.f32 %v563_v23, %v559_v22 }
 0x3fb   :  { %v124_v2 = vsub.f32 1.0, %v123_v1  ;;  %v537_v3 = vpop.xlane.xlu1 %536 }
 0x3fc   :  { %741 = vrcp.f32 %v537_v3  ;;  %v549_v17 = vand.u32 2147483648, %v537_v3  ;;  %v547_v47 = vand.u32 2147483647, %v537_v3  ;;  %vm543_vm11 = vweird.f32 %v537_v3 }
 0x3fd   :  { %v125_v6 = vmul.f32 %v740_v0, %v124_v2 }
 0x3fe   :  { %v550_v21 = vor.u32 1.1754944e-38, %v549_v17  ;;  %vm548_vm1 = vcmp.eq.f32.partialorder %v547_v47, 8.507059e+37 }
 0x3ff   :  { %v126_v10 = vadd.f32 %v740_v0, %v125_v6 }
 0x401   :  { %v130_v11 = vsel %vm129_vm6, %v740_v0, %v126_v10 }
 0x402   :  { %v742_v13 = vpop.eup %741  ;;  %v135_v14 = vsel %vm132_vm9, %v134_v62, %v130_v11 }
 0x403   :  { %v539_v15 = vmul.f32 %v742_v13, %v537_v3  ;;  %v136_v4 = vmul.f32 %v736_v52, %v135_v14  ;;  %vm544_vm10 = vweird.f32 %v742_v13 }
 0x404   :  { %vm545_vm12 = vmor %vm543_vm11, %vm544_vm10 }
 0x405   :  { %v540_v16 = vsub.f32 1.0, %v539_v15  ;;  %578 = vperm.xlu1 %698, %v136_v4   ;;  %583 = vperm.xlu2 %699, %v136_v4  }
 0x407   :  { %v541_v18 = vmul.f32 %v742_v13, %v540_v16 }
 0x409   :  { %v542_v38 = vadd.f32 %v742_v13, %v541_v18 }
 0x40b   :  { %v546_v20 = vsel %vm545_vm12, %v742_v13, %v542_v38 }
 0x40c   :  { %v551_v24 = vsel %vm548_vm1, %v550_v21, %v546_v20 }
 0x40d   :  { %v552_v8 = vmul.f32 %v738_v28, %v551_v24  ;;  %700 = vset.pattern.permute.xlu2 %v809_v27 }
 0x40f   :  { %v557_v31 = vmul.f32 %v555_v26, %v552_v8 }
 0x411   :  { %v566_v9 = vadd.f32 %v565_v29, %v557_v31 }
 0x413   :  { %588 = vrot.lane.b32.xlu0 %v566_v9, %s810_s21  ;;  %571 = vrot.lane.b32.xlu2 %v566_v9, %s811_s22 }
 0x414   :  { %568 = vrot.lane.b32.xlu1 %v566_v9, %s812_s23 }
 0x41b   :  { %607 = vperm.xlu0 %701, %v106_v32   ;;  %597 = vperm.xlu2 %700, %v136_v4  }
 0x41c   :  { %591 = vrot.lane.b32.xlu1 %v566_v9, %s813_s3 }
 0x423   :  { %92 = vrot.lane.b32.xlu2 %v930_v50, %s814_s24 }
 0x42b   :  { %98 = vrot.lane.b32.xlu2 %v908_v25, %s815_s25 }
 0x45f   :  { %v584_v33 = vpop.permute.xlu2 %583 }
 0x460   :  { %v586_v42 = vmul.f32 %v584_v33, %v566_v9 }
 0x46d   :  { %v572_v34 = vpop.permute.xlu2 %571 }
 0x475   :  { %v598_v35 = vpop.permute.xlu2 %597 }
 0x477   :  { %v579_v37 = vpop.permute.xlu1 %578 }
 0x47d   :  { %v93_v36 = vpop.permute.xlu2 %92 }
 0x47e   :  { %96 = vst.msk [vmem:[#allocation3] sm:$0xf] %vm95_vm4, %v93_v36 }
 0x47f   :  { %645 = dma.vmem_to_hbm [thread:$0]  %s641_s30, 64, %s643_s28, [#allocation4]  }
 0x485   :  { %v99_v39 = vpop.permute.xlu2 %98  ;;  %v589_v50 = vpop.permute.xlu0 %588 }
 0x486   :  { %v569_v19 = vpop.permute.xlu1 %568  ;;  %101 = vst.msk [vmem:[#allocation5] sm:$0xf] %vm95_vm4, %v99_v39 }
 0x487   :  { %v575_v41 = vsel %vm574_vm13, %v569_v19, %v572_v34  ;;  %656 = dma.vmem_to_hbm [thread:$0]  %s652_s9, 64, %s654_s12, [#allocation6]  }
 0x488   :  { %v581_v12 = vmul.f32 %v579_v37, %v575_v41 }
 0x48a   :  { %v587_v25 = vadd.f32 %v586_v42, %v581_v12 }
 0x48d   :  { %v608_v49 = vpop.permute.xlu0 %607 }
 0x48e   :  { %v592_v43 = vpop.permute.xlu1 %591 }
 0x48f   :  { %v595_v44 = vsel %vm594_vm14, %v589_v50, %v592_v43 }
 0x490   :  { %v600_v45 = vmul.f32 %v598_v35, %v595_v44 }
 0x492   :  { %v601_v30 = vadd.f32 %v600_v45, %v587_v25 }
 0x494   :  { %v602_v46 = vmax.f32 %v601_v30, 1e-30 }
 0x496   :  { %743 = vlog2.f32 %v602_v46 }
 0x49c   :  { %v744_v48 = vpop.eup %743 }
 0x49d   :  { %v604_v40 = vmul.f32 0.6931472, %v744_v48 }
 0x49f   :  { %v610_v52 = vmul.f32 %v608_v49, %v604_v40 }
 0x4a1   :  { %v611_v51 = vmul.f32 1.442695, %v610_v52 }
 0x4a3   :  { %745 = vpow2.f32 %v611_v51 }
 0x4a9   :  { %v746_v53 = vpop.eup %745 }
 0x4aa   :  { %v613_v54 = vsel %vm528_vm7, %v746_v53, 0.0 }
 0x4ab   :  { %614 = vadd.xlane.f32.xlu1 %v613_v54 }
 0x51e   :  { %v615_v56 = vpop.xlane.xlu1 %614 }
 0x51f   :  { %v616_v57 = vadd.f32 1e-16, %v615_v56 }
 0x521   :  { %747 = vrcp.f32 %v616_v57  ;;  %v628_v60 = vand.u32 2147483648, %v616_v57  ;;  %v626_v61 = vand.u32 2147483647, %v616_v57  ;;  %vm622_vm15 = vweird.f32 %v616_v57 }
 0x523   :  { %v629_v0 = vor.u32 1.1754944e-38, %v628_v60  ;;  %vm627_vm2 = vcmp.eq.f32.partialorder %v626_v61, 8.507059e+37 }
 0x527   :  { %v748_v28 = vpop.eup %747 }
 0x528   :  { %v618_v58 = vmul.f32 %v748_v28, %v616_v57  ;;  %vm623_vm4 = vweird.f32 %v748_v28 }
 0x529   :  { %vm624_vm0 = vmor %vm622_vm15, %vm623_vm4 }
 0x52a   :  { %v619_v59 = vsub.f32 1.0, %v618_v58 }
 0x52c   :  { %v620_v55 = vmul.f32 %v748_v28, %v619_v59 }
 0x52e   :  { %v621_v63 = vadd.f32 %v748_v28, %v620_v55 }
 0x530   :  { %v625_v1 = vsel %vm624_vm0, %v748_v28, %v621_v63 }
 0x531   :  { %v630_v2 = vsel %vm627_vm2, %v629_v0, %v625_v1 }
 0x532   :  { %v631_v3 = vmul.f32 %v746_v53, %v630_v2 }
 0x534   :  { %632 = vst.msk [vmem:[%s1088_s5] sm:$0xf] %vm528_vm7, %v631_v3 }
 0x535   :  { %797 = dma.done.wait [#allocation4], 64  }
 0x536   :  { %798 = vsyncadd [#allocation4], 4294967232 }
 0x537   :  { %799 = dma.done.wait [#allocation6], 64  }
 0x538   :  { %800 = vsyncadd [#allocation6], 4294967232 }
 0x539   :  { %667 = vsyncpa [#allocation4], 1 }
 0x53a   :  { %668 = vsyncpa [#allocation6], 1 }

</bundles_post_ra>
